<compile_context>
chip_gen: v7x
topology: tpu7x:2x2x1
jax: 0.10.0
libtpu: 0.0.40
codegen_flags: <defaults>
</compile_context>

<pallas_src>
import functools

import jax
import jax.numpy as jnp
from jax.experimental import pallas as pl
from jax.experimental.pallas import tpu as pltpu


# ---------------------------------------------------------------------------
# VMEM / tiling helpers
# ---------------------------------------------------------------------------

def _vmem_capacity_bytes():
    """Physical VMEM of the current chip; conservative 64 MiB fallback."""
    try:
        info = pltpu.get_tpu_info()
        cap = getattr(info, "vmem_capacity_bytes", None)
        if cap:
            return int(cap)
    except Exception:
        pass
    return 64 * 1024 * 1024


def _vmem_limit(need_bytes, cap_bytes):
    """Scoped-VMEM limit: generous enough for `need_bytes`, below physical."""
    return int(min(max(need_bytes, 16 << 20), cap_bytes - (8 << 20)))


def _choose_hw_tile(C, HW, itemsize, target_block_bytes):
    """Largest 128-multiple lane tile with C*tile*itemsize <= target, clipped
    to ceil(HW/128)*128.  HW is zero-padded up to a tile multiple by caller."""
    hw_ceil = -(-HW // 128) * 128
    max_lanes = (target_block_bytes // max(C * itemsize, 1)) // 128 * 128
    max_lanes = max(128, max_lanes)
    return int(min(hw_ceil, max_lanes))


# ---------------------------------------------------------------------------
# fused single-pass kernel: pool -> channel MLP -> gate apply, one x read
# ---------------------------------------------------------------------------

def _fused_kernel(x_ref, w1t_ref, b1_ref, w2_ref, b2_ref, wc_ref, bc_ref,
                  o_ref, *, inv_hw):
    # x_ref : (1, C, HW)   native dtype
    # w1t   : (C, Cr) f32  (= linear_1.weight.T)
    # b1    : (1, Cr) f32
    # w2    : (C, Cr) f32  (= linear_2.weight, PyTorch layout)
    # b2    : (C, 1)  f32
    # wc    : (C, 1)  f32  (1x1-conv weight as a column)
    # bc    : (1,)    f32  SMEM scalar
    x = x_ref[0]                                                   # (C, HW)

    # --- cSE channel gate: mean over spatial (f32 accumulation) + tiny MLP --
    pooled = jnp.sum(x, axis=-1, keepdims=True,
                     dtype=jnp.float32) * inv_hw                   # (C, 1)
    h = jnp.sum(w1t_ref[...] * pooled, axis=0, keepdims=True) \
        + b1_ref[...]                                              # (1, Cr)
    h = jnp.maximum(h, 0.0)
    s_logit = jnp.sum(w2_ref[...] * h, axis=-1, keepdims=True) \
        + b2_ref[...]                                              # (C, 1)
    s = jax.nn.sigmoid(s_logit)                                    # (C, 1)

    # --- sSE spatial gate: VPU mul + XLU sublane reduce, f32 accumulate -----
    wc = wc_ref[...].astype(x.dtype)                               # (C, 1)
    logit = jnp.sum(x * wc, axis=0, keepdims=True,
                    dtype=jnp.float32) + bc_ref[0]                 # (1, HW)

    # out = x * (sigmoid_channel + sigmoid_spatial), one fused multiply
    gate = s + jax.nn.sigmoid(logit)                               # (C, HW) f32
    o_ref[0] = (x * gate.astype(x.dtype)).astype(o_ref.dtype)


# ---------------------------------------------------------------------------
# fallback pass 1: per-sample channel sums (HW-tiled reduction)
# ---------------------------------------------------------------------------

def _pool_kernel(x_ref, sum_ref):
    # x_ref: (1, C, HW_TILE); sum_ref: (1, C, 1) resident across the HW axis.
    @pl.when(pl.program_id(1) == 0)
    def _():
        sum_ref[...] = jnp.zeros_like(sum_ref)

    sum_ref[...] += jnp.sum(x_ref[...], axis=-1, keepdims=True,
                            dtype=jnp.float32)


# ---------------------------------------------------------------------------
# fallback pass 2: fused gate apply  out = x * (s_channel + sigmoid(wc.x + bc))
# ---------------------------------------------------------------------------

def _apply_kernel(x_ref, s_ref, wc_ref, bc_ref, o_ref):
    x = x_ref[0]                                                   # (C, TILE)
    s = s_ref[0]                                                   # (C, 1) f32
    wc = wc_ref[...].astype(x.dtype)                               # (C, 1)
    logit = jnp.sum(x * wc, axis=0, keepdims=True,
                    dtype=jnp.float32) + bc_ref[0]                 # (1, TILE)
    gate = s + jax.nn.sigmoid(logit)                               # (C, TILE)
    o_ref[0] = (x * gate.astype(x.dtype)).astype(o_ref.dtype)


# ---------------------------------------------------------------------------
# wrapper
# ---------------------------------------------------------------------------

def scse_forward(x_nchw, params, *, force_two_pass=False):
    """x_nchw: (N, C, H, W). Returns (N, C, H, W), same dtype as input."""
    w1, b1, w2, b2, wc, bc = params
    N, C, H, W = x_nchw.shape
    HW = H * W
    Cr = w1.shape[0]
    dtype = x_nchw.dtype
    itemsize = jnp.dtype(dtype).itemsize
    vmem_cap = _vmem_capacity_bytes()

    x = x_nchw.reshape(N, C, HW)

    # small resident operands (f32)
    w1t = jnp.asarray(w1, jnp.float32).T                  # (C, Cr)
    b1r = jnp.asarray(b1, jnp.float32).reshape(1, Cr)     # (1, Cr)
    w2f = jnp.asarray(w2, jnp.float32)                    # (C, Cr)
    b2c = jnp.asarray(b2, jnp.float32).reshape(C, 1)      # (C, 1)
    wc_col = jnp.asarray(wc, jnp.float32).reshape(C, 1)   # (C, 1)
    bc_s = jnp.asarray(bc, jnp.float32).reshape(1)        # (1,) SMEM

    # ---------------- fused single-pass path --------------------------------
    sample_bytes = C * HW * itemsize
    f32_sample = C * HW * 4
    fused_need = 4 * sample_bytes + 2 * f32_sample + (4 << 20)
    use_fused = (not force_two_pass) and fused_need <= vmem_cap - (16 << 20)

    if use_fused:
        out = pl.pallas_call(
            functools.partial(_fused_kernel, inv_hw=float(1.0 / HW)),
            out_shape=jax.ShapeDtypeStruct((N, C, HW), dtype),
            grid=(N,),
            in_specs=[
                pl.BlockSpec((1, C, HW), lambda b: (b, 0, 0)),          # x
                pl.BlockSpec((C, Cr), lambda b: (0, 0)),                # w1.T
                pl.BlockSpec((1, Cr), lambda b: (0, 0)),                # b1
                pl.BlockSpec((C, Cr), lambda b: (0, 0)),                # w2
                pl.BlockSpec((C, 1), lambda b: (0, 0)),                 # b2
                pl.BlockSpec((C, 1), lambda b: (0, 0)),                 # wc
                pl.BlockSpec(memory_space=pltpu.MemorySpace.SMEM),      # bc
            ],
            out_specs=pl.BlockSpec((1, C, HW), lambda b: (b, 0, 0)),
            compiler_params=pltpu.CompilerParams(
                dimension_semantics=("parallel",),
                vmem_limit_bytes=_vmem_limit(fused_need, vmem_cap)),
        )(x, w1t, b1r, w2f, b2c, wc_col, bc_s)
        return out.reshape(N, C, H, W)

    # ---------------- fallback two-pass path ---------------------------------
    # Blocks sized to ~VMEM_cap/16 (8 MiB on 128-MiB chips, 4 MiB on v7x).
    target_block_bytes = max(vmem_cap // 16, 2 << 20)
    hw_tile = _choose_hw_tile(C, HW, itemsize, target_block_bytes)
    hw_pad = -(-HW // hw_tile) * hw_tile
    if hw_pad != HW:
        # zero pad: exact for the pooled sum; padded outputs are sliced off.
        x = jnp.pad(x, ((0, 0), (0, 0), (0, hw_pad - HW)))
    n_tiles = hw_pad // hw_tile

    block_bytes = C * hw_tile * itemsize
    block_f32 = C * hw_tile * 4

    # ---- pass 1: pooled channel sums ---------------------------------------
    pool_need = 2 * block_bytes + block_f32 + (2 << 20)
    pooled_sum = pl.pallas_call(
        _pool_kernel,
        out_shape=jax.ShapeDtypeStruct((N, C, 1), jnp.float32),
        grid=(N, n_tiles),
        in_specs=[pl.BlockSpec((1, C, hw_tile), lambda b, t: (b, 0, t))],
        out_specs=pl.BlockSpec((1, C, 1), lambda b, t: (b, 0, 0)),
        compiler_params=pltpu.CompilerParams(
            dimension_semantics=("parallel", "arbitrary"),
            vmem_limit_bytes=_vmem_limit(pool_need, vmem_cap)),
    )(x)

    # ---- channel gate: tiny batched matmuls over N in plain JAX -------------
    pooled = pooled_sum[..., 0] / jnp.float32(HW)                  # (N, C)
    h = jax.nn.relu(pooled @ jnp.asarray(w1, jnp.float32).T
                    + jnp.asarray(b1, jnp.float32))                # (N, Cr)
    s = jax.nn.sigmoid(h @ jnp.asarray(w2, jnp.float32).T
                       + jnp.asarray(b2, jnp.float32))             # (N, C)
    s = s.reshape(N, C, 1)

    # ---- pass 2: fused gate apply -------------------------------------------
    apply_need = 4 * block_bytes + 2 * block_f32 + (2 << 20)
    out = pl.pallas_call(
        _apply_kernel,
        out_shape=jax.ShapeDtypeStruct((N, C, hw_pad), dtype),
        grid=(N, n_tiles),
        in_specs=[
            pl.BlockSpec((1, C, hw_tile), lambda b, t: (b, 0, t)),   # x
            pl.BlockSpec((1, C, 1), lambda b, t: (b, 0, 0)),         # chan gate
            pl.BlockSpec((C, 1), lambda b, t: (0, 0)),               # conv w
            pl.BlockSpec(memory_space=pltpu.MemorySpace.SMEM),       # conv b
        ],
        out_specs=pl.BlockSpec((1, C, hw_tile), lambda b, t: (b, 0, t)),
        compiler_params=pltpu.CompilerParams(
            dimension_semantics=("parallel", "parallel"),
            vmem_limit_bytes=_vmem_limit(apply_need, vmem_cap)),
    )(x, s, wc_col, bc_s)

    if hw_pad != HW:
        out = out[..., :HW]
    return out.reshape(N, C, H, W)


# ---------------------------------------------------------------------------
# parameters & reference
# ---------------------------------------------------------------------------

def init_params(key, in_ch, r):
    """Deterministic synthetic parameters matching SCSE(in_ch, r) shapes."""
    k1, k2, k3, k4, k5, k6 = jax.random.split(key, 6)
    cr = in_ch // r
    w1 = jax.random.normal(k1, (cr, in_ch), jnp.float32) * 0.1   # Linear(in_ch, in_ch//r)
    b1 = jax.random.normal(k2, (cr,), jnp.float32) * 0.1
    w2 = jax.random.normal(k3, (in_ch, cr), jnp.float32) * 0.1   # Linear(in_ch//r, in_ch)
    b2 = jax.random.normal(k4, (in_ch,), jnp.float32) * 0.1
    wc = jax.random.normal(k5, (1, in_ch, 1, 1), jnp.float32) * 0.1  # Conv2d(in_ch, 1, 1)
    bc = jax.random.normal(k6, (1,), jnp.float32) * 0.1
    return w1, b1, w2, b2, wc, bc


def scse_reference(x, params):
    """Pure-JAX reference of the PyTorch forward."""
    w1, b1, w2, b2, wc, bc = params
    N, C, H, W = x.shape
    pooled = x.reshape(N, C, H * W).mean(-1)                 # (N, C)
    h = jax.nn.relu(pooled @ w1.T + b1)                      # (N, C//r)
    s = jax.nn.sigmoid(h @ w2.T + b2)                        # (N, C)
    cse = x * s[:, :, None, None]
    logit = jnp.einsum('nchw,oc->nohw', x, wc.reshape(1, C)) + bc.reshape(1, 1, 1, 1)
    sse = x * jax.nn.sigmoid(logit)
    return cse + sse


if __name__ == "__main__":
    key = jax.random.PRNGKey(0)
    kx, kx2, kp = jax.random.split(key, 3)

    C, r = 4, 2
    params = init_params(kp, C, r)

    # case 1: 128-aligned spatial extent (exercises fused + two-pass paths)
    x1 = jax.random.normal(kx, (2, C, 16, 16), jnp.float32)
    # case 2: non-128-aligned spatial extent (exercises padding in two-pass)
    x2 = jax.random.normal(kx2, (2, C, 10, 10), jnp.float32)

    for x in (x1, x2):
        ref = scse_reference(x, params)
        for force in (False, True):
            out = scse_forward(x, params, force_two_pass=force)
            out = jax.block_until_ready(out)
            assert out.shape == x.shape
            assert jnp.allclose(out, ref, atol=1e-5, rtol=1e-5), (
                f"mismatch shape={x.shape} force_two_pass={force}")

    print("KERNEL_OK")
</pallas_src>

<mosaic_0001>
module attributes {stable_mosaic.version = 11 : i64} {
  func.func @_fused_kernel(%arg0: i32, %arg1: memref<1x4x256xf32, #tpu.memory_space<vmem>>, %arg2: memref<4x2xf32, #tpu.memory_space<vmem>>, %arg3: memref<1x2xf32, #tpu.memory_space<vmem>>, %arg4: memref<4x2xf32, #tpu.memory_space<vmem>>, %arg5: memref<4x1xf32, #tpu.memory_space<vmem>>, %arg6: memref<4x1xf32, #tpu.memory_space<vmem>>, %arg7: memref<1xf32, #tpu.memory_space<smem>>, %arg8: memref<1x4x256xf32, #tpu.memory_space<vmem>>) attributes {dimension_semantics = [#tpu.dimension_semantics<parallel>], iteration_bounds = array<i64: 2>, scalar_prefetch = 0 : i64, scratch_operands = 0 : i64, tpu.core_type = #tpu.core_type<tc>, window_params = [{transform_indices = @transform_0, window_bounds = array<i64: 1, 4, 256>}, {pipeline_mode = #tpu.pipeline_mode<synchronous>, transform_indices = @transform_1, window_bounds = array<i64: 4, 2>}, {pipeline_mode = #tpu.pipeline_mode<synchronous>, transform_indices = @transform_2, window_bounds = array<i64: 1, 2>}, {pipeline_mode = #tpu.pipeline_mode<synchronous>, transform_indices = @transform_3, window_bounds = array<i64: 4, 2>}, {pipeline_mode = #tpu.pipeline_mode<synchronous>, transform_indices = @transform_4, window_bounds = array<i64: 4, 1>}, {pipeline_mode = #tpu.pipeline_mode<synchronous>, transform_indices = @transform_5, window_bounds = array<i64: 4, 1>}, {transform_indices = @transform_6, window_bounds = array<i64: 1>}, {transform_indices = @transform_7, window_bounds = array<i64: 1, 4, 256>}]} {
    %c0 = arith.constant 0 : index
    %c0_0 = arith.constant 0 : index
    %c0_1 = arith.constant 0 : index
    %0 = vector.load %arg1[%c0, %c0_0, %c0_1] : memref<1x4x256xf32, #tpu.memory_space<vmem>>, vector<1x4x256xf32>
    %1 = vector.shape_cast %0 : vector<1x4x256xf32> to vector<4x256xf32>
    %cst = arith.constant dense<0.000000e+00> : vector<4xf32>
    %2 = vector.multi_reduction <add>, %1, %cst [1] : vector<4x256xf32> to vector<4xf32>
    %3 = vector.shape_cast %2 : vector<4xf32> to vector<4x1xf32>
    %cst_2 = arith.constant 3.906250e-03 : f32
    %4 = vector.broadcast %cst_2 : f32 to vector<4x1xf32>
    %5 = arith.mulf %3, %4 : vector<4x1xf32>
    %c0_3 = arith.constant 0 : index
    %c0_4 = arith.constant 0 : index
    %6 = vector.load %arg2[%c0_3, %c0_4] : memref<4x2xf32, #tpu.memory_space<vmem>>, vector<4x2xf32>
    %7 = vector.broadcast %5 : vector<4x1xf32> to vector<4x2xf32>
    %8 = arith.mulf %6, %7 : vector<4x2xf32>
    %cst_5 = arith.constant dense<0.000000e+00> : vector<2xf32>
    %9 = vector.multi_reduction <add>, %8, %cst_5 [0] : vector<4x2xf32> to vector<2xf32>
    %10 = vector.shape_cast %9 : vector<2xf32> to vector<1x2xf32>
    %c0_6 = arith.constant 0 : index
    %c0_7 = arith.constant 0 : index
    %11 = vector.load %arg3[%c0_6, %c0_7] : memref<1x2xf32, #tpu.memory_space<vmem>>, vector<1x2xf32>
    %12 = arith.addf %10, %11 : vector<1x2xf32>
    %cst_8 = arith.constant 0.000000e+00 : f32
    %13 = vector.broadcast %cst_8 : f32 to vector<1x2xf32>
    %14 = arith.maximumf %12, %13 : vector<1x2xf32>
    %c0_9 = arith.constant 0 : index
    %c0_10 = arith.constant 0 : index
    %15 = vector.load %arg4[%c0_9, %c0_10] : memref<4x2xf32, #tpu.memory_space<vmem>>, vector<4x2xf32>
    %16 = vector.broadcast %14 : vector<1x2xf32> to vector<4x2xf32>
    %17 = arith.mulf %15, %16 : vector<4x2xf32>
    %cst_11 = arith.constant dense<0.000000e+00> : vector<4xf32>
    %18 = vector.multi_reduction <add>, %17, %cst_11 [1] : vector<4x2xf32> to vector<4xf32>
    %19 = vector.shape_cast %18 : vector<4xf32> to vector<4x1xf32>
    %c0_12 = arith.constant 0 : index
    %c0_13 = arith.constant 0 : index
    %20 = vector.load %arg5[%c0_12, %c0_13] : memref<4x1xf32, #tpu.memory_space<vmem>>, vector<4x1xf32>
    %21 = arith.addf %19, %20 : vector<4x1xf32>
    %22 = arith.negf %21 : vector<4x1xf32>
    %23 = math.exp %22 : vector<4x1xf32>
    %cst_14 = arith.constant 1.000000e+00 : f32
    %24 = vector.broadcast %cst_14 : f32 to vector<4x1xf32>
    %25 = arith.addf %24, %23 : vector<4x1xf32>
    %26 = arith.divf %24, %25 : vector<4x1xf32>
    %c0_15 = arith.constant 0 : index
    %c0_16 = arith.constant 0 : index
    %27 = vector.load %arg6[%c0_15, %c0_16] : memref<4x1xf32, #tpu.memory_space<vmem>>, vector<4x1xf32>
    %28 = vector.broadcast %27 : vector<4x1xf32> to vector<4x256xf32>
    %29 = arith.mulf %1, %28 : vector<4x256xf32>
    %cst_17 = arith.constant dense<0.000000e+00> : vector<256xf32>
    %30 = vector.multi_reduction <add>, %29, %cst_17 [0] : vector<4x256xf32> to vector<256xf32>
    %31 = vector.shape_cast %30 : vector<256xf32> to vector<1x256xf32>
    %c0_18 = arith.constant 0 : index
    %32 = memref.load %arg7[%c0_18] : memref<1xf32, #tpu.memory_space<smem>>
    %33 = vector.broadcast %32 : f32 to vector<1x256xf32>
    %34 = arith.addf %31, %33 : vector<1x256xf32>
    %35 = arith.negf %34 : vector<1x256xf32>
    %36 = math.exp %35 : vector<1x256xf32>
    %cst_19 = arith.constant 1.000000e+00 : f32
    %37 = vector.broadcast %cst_19 : f32 to vector<1x256xf32>
    %38 = arith.addf %37, %36 : vector<1x256xf32>
    %39 = arith.divf %37, %38 : vector<1x256xf32>
    %40 = vector.broadcast %26 : vector<4x1xf32> to vector<4x256xf32>
    %41 = vector.broadcast %39 : vector<1x256xf32> to vector<4x256xf32>
    %42 = arith.addf %40, %41 : vector<4x256xf32>
    %43 = arith.mulf %1, %42 : vector<4x256xf32>
    %c0_20 = arith.constant 0 : index
    %c0_21 = arith.constant 0 : index
    %c0_22 = arith.constant 0 : index
    %44 = vector.load %arg8[%c0_20, %c0_21, %c0_22] : memref<1x4x256xf32, #tpu.memory_space<vmem>>, vector<1x4x256xf32>
    %45 = vector.shape_cast %44 : vector<1x4x256xf32> to vector<4x256xf32>
    %46 = vector.shape_cast %43 : vector<4x256xf32> to vector<1x4x256xf32>
    tpu.vector_store %arg8[%c0_20, %c0_21, %c0_22], %46 {strides = array<i32>} : memref<1x4x256xf32, #tpu.memory_space<vmem>>, vector<1x4x256xf32>,
    return
  }
  func.func @transform_0(%arg0: i32) -> (i32, i32, i32) {
    %c0_i32 = arith.constant 0 : i32
    %c0_i32_0 = arith.constant 0 : i32
    %c0_i32_1 = arith.constant 0 : i32
    return %arg0, %c0_i32, %c0_i32_0 : i32, i32, i32
  }
  func.func @transform_1(%arg0: i32) -> (i32, i32) {
    %c0_i32 = arith.constant 0 : i32
    %c0_i32_0 = arith.constant 0 : i32
    %c0_i32_1 = arith.constant 0 : i32
    return %c0_i32, %c0_i32_0 : i32, i32
  }
  func.func @transform_2(%arg0: i32) -> (i32, i32) {
    %c0_i32 = arith.constant 0 : i32
    %c0_i32_0 = arith.constant 0 : i32
    %c0_i32_1 = arith.constant 0 : i32
    return %c0_i32, %c0_i32_0 : i32, i32
  }
  func.func @transform_3(%arg0: i32) -> (i32, i32) {
    %c0_i32 = arith.constant 0 : i32
    %c0_i32_0 = arith.constant 0 : i32
    %c0_i32_1 = arith.constant 0 : i32
    return %c0_i32, %c0_i32_0 : i32, i32
  }
  func.func @transform_4(%arg0: i32) -> (i32, i32) {
    %c0_i32 = arith.constant 0 : i32
    %c0_i32_0 = arith.constant 0 : i32
    %c0_i32_1 = arith.constant 0 : i32
    return %c0_i32, %c0_i32_0 : i32, i32
  }
  func.func @transform_5(%arg0: i32) -> (i32, i32) {
    %c0_i32 = arith.constant 0 : i32
    %c0_i32_0 = arith.constant 0 : i32
    %c0_i32_1 = arith.constant 0 : i32
    return %c0_i32, %c0_i32_0 : i32, i32
  }
  func.func @transform_6(%arg0: i32) -> i32 {
    %c0_i32 = arith.constant 0 : i32
    %c0_i32_0 = arith.constant 0 : i32
    return %c0_i32 : i32
  }
  func.func @transform_7(%arg0: i32) -> (i32, i32, i32) {
    %c0_i32 = arith.constant 0 : i32
    %c0_i32_0 = arith.constant 0 : i32
    %c0_i32_1 = arith.constant 0 : i32
    return %arg0, %c0_i32, %c0_i32_0 : i32, i32, i32
  }
}

</mosaic_0001>

<bundles_post_ra>
// kernel: tpu_custom_call.1
= control target key start
LH: loop header
LB: loop body
LE: loop exit
PB: predicated region body
PF: predicated region fallthrough
CT: control target
= control target key end

     0   :  { %s764_s0 = inlined_call_operand.vmem [shape: f32[2,4,256], index: 0, kind: input, shape index: {}]   ;;  %s765_s1 = inlined_call_operand.vmem [shape: f32[4,2], index: 1, kind: input, shape index: {}]   ;;  %s766_s2 = inlined_call_operand.vmem [shape: f32[1,2], index: 2, kind: input, shape index: {}]   ;;  %s767_s3 = inlined_call_operand.vmem [shape: f32[4,2], index: 3, kind: input, shape index: {}]   ;;  %s768_s4 = inlined_call_operand.vmem [shape: f32[4,1], index: 4, kind: input, shape index: {}]   ;;  %s769_s5 = inlined_call_operand.vmem [shape: f32[4,1], index: 5, kind: input, shape index: {}]   ;;  %s770_s6 = inlined_call_operand.<no memory space> [shape: f32[1], index: 6, kind: input, shape index: {}]   ;;  %s771_s7 = inlined_call_operand.hbm [shape: f32[2,4,256], index: 7, kind: output, shape index: {}]  }
   0x1   :  { %12 = sst [smem:[#allocation2]] %s770_s6 }
   0x2   :  { %13 = vsyncpa [#allocation4], 0 }
   0x3   :  { %15 = vsyncpa [#allocation4 + $0x1], 0  ;;  %s636_s26 = smov 0   ;;  %s638_s27 = smov 0  }
   0x4   :  { %s640_s28 = smov 0   ;;  %s642_s29 = smov 0  }
   0x5 LB: > { %s657_s6 = sadd.s32 4294967295, %s588_s29   ;;  %s453_s30 = sadd.s32 4294967294, %s588_s29   ;;  %s588_s29 = sphi %s642_s29, %s777_s29   ;;  %s584_s28 = sphi %s640_s28, %s776_s28   ;;  %s580_s27 = sphi %s638_s27, %s775_s27   ;;  %s576_s26 = sphi %s636_s26, %s774_s26  }
   0x6   : > { %s661_s8 = sadd.s32 1, %s588_s29   ;;  %s180_s9 = sadd.s32 1, %s584_s28 }
   0x7   : > { %s177_s10 = ssub.s32 %s588_s29, %s661_s8  ;;  %p190_p0 = scmp.ne.s32.totalorder %s584_s28, %s580_s27 }
   0x8   : > { %p178_p1 = scmp.eq.s32.totalorder %s177_s10, 0  ;;  %p191_p2 = scmp.eq.s32.totalorder %s657_s6, 1 }
   0x9   : > { %p196_p3 = scmp.ne.s32.totalorder %s580_s27, %s576_s26  ;;  %p197_p4 = scmp.eq.s32.totalorder %s453_s30, 1 }
   0xa   : > { %s672_s11 = scalar_select %p178_p1, %s584_s28, %s180_s9  }
   0xb   : > { %p674_p5 = por %p191_p2, %p190_p0  ;;  %p678_p6 = por %p197_p4, %p196_p3 }
   0xc   : > { %p456_p7 = scmp.ge.s32.totalorder %s588_s29, 1  ;;  %p241_p8 = scmp.lt.s32.totalorder %s588_s29, 3 }
   0xe   : > { %p242_p9 = pnand %p456_p7, %p241_p8 }
   0xf   : > { %p273_p10 = scmp.lt.s32.totalorder (!%p242_p9), %s657_s6, 1  ;;  %vm282_vm0 = vcmask (!%p242_p9), 1043456   ;;  %v319_v5 = vld [vmem:[%s769_s5] sm:$0xf] (!%p242_p9)  ;;  %v590_v6 = vmov (!%p242_p9), 0   ;;  %vm291_vm1 = vcmask (!%p242_p9), 11264   ;;  %v303_v15 = vlaneseq (!%p242_p9) }
  0x10   : > { %245 = sbr.rel (%p242_p9) target bundleno = 519 (0x207), region = 48  ;;  %511 = vset.pattern.permute.xlu1 (!%p242_p9), %v590_v6  ;;  %512 = vset.pattern.permute.xlu0 (!%p242_p9), %v590_v6  ;;  %v289_v7 = vld [vmem:[%s765_s1] sm:$0xf] (!%p242_p9)  ;;  %v591_v35 = vmov (!%p242_p9), 839922192   ;;  %s469_s17 = sshll.u32 (!%p242_p9), %s657_s6, 7 }
  0x11   : > { %322 = vperm.xlu1 (!%p242_p9), %511, %v319_v5   ;;  %v304_v18 = vshrl.u32 (!%p242_p9), %v303_v15, 7  ;;  %v299_v19 = vld [vmem:[%s766_s2] sm:$0x1] (!%p242_p9)  ;;  %v325_v36 = vunpack.c.l.s4 (!%p242_p9), %v591_v35  ;;  %s722_s22 = scalar_lea.hbm (!%p242_p9), %s771_s7, %s469_s17 }
  0x12   : > { %v302_v24 = vld [vmem:[%s767_s3] sm:$0xf] (!%p242_p9) }
  0x13   : > { %v305_v22 = vsub.s32 (!%p242_p9), 0, %v304_v18  ;;  %v311_v28 = vld [vmem:[%s768_s4] sm:$0xf] (!%p242_p9)  ;;  %v326_v37 = vunpack.c.0.s8 (!%p242_p9), %v325_v36 }
  0x15   : > { %v329_v38 = vsub.s32 (!%p242_p9), %v326_v37, %v304_v18 }
  0x17   : > { %s274_s14 = scalar_select %p273_p10, %s657_s6, 1 }
  0x18   : > { %s592_s6 = smov [#allocation3]  }
  0x19   : > { %s468_s15 = sshll.u32 %s274_s14, 3  ;;  %s350_s14 = sld [smem:[#allocation2]] }
  0x1a   : > { %s277_s18 = scalar_lea.vmem %s764_s0, %s468_s15  ;;  %s270_s15 = sand.u32 1, %s580_s27  }
  0x1b   : > { %v689_v0 = vld [vmem:[%s277_s18] sm:$0xff]  ;;  %s457_s16 = sshll.u32 %s270_s15, 3  ;;  %s380_s23 = scalar_lea.sflag [#allocation4], %s270_s15 }
  0x1c   : > { %v280_v1 = vcombine.high %v689_v0, %v689_v0  ;;  %v283_v2 = vsel %vm282_vm0, %v689_v0, 0.0  ;;  %s272_s18 = scalar_lea.vmem [#allocation3], %s457_s16  ;;  %s530_s25 = sshll.u32 %s592_s6, 4  ;;  %s531_s25 = int_to_ptr.vmem [resolvable:$false] %s530_s25 }
  0x1d   : > { %s394_s19 = sshll.u32 %s272_s18, 4  ;;  %s532_s30 = scalar_lea.vmem %s531_s25, 256  ;;  %s724_s19 = int_to_ptr.vmem [resolvable:$true] %s394_s19 }
  0x1e   : > { %v284_v3 = vsel %vm282_vm0, %v280_v1, 0.0  ;;  %s526_s24 = scalar_lea.vmem %s724_s19, 128  ;;  %p533_p0 = scmp.lt.s32.totalorder %s724_s19, %s531_s25 }
  0x1f   : > { %v285_v4 = vadd.f32 %v284_v3, %v283_v2  ;;  %v351_v56 = vstv %s350_s14  ;;  %p527_p11 = scmp.ne.s32.totalorder %s724_s19, %s526_s24  ;;  %p534_p1 = scmp.lt.s32.totalorder %s532_s30, %s526_s24 }
  0x21   : > { %286 = vadd.xlane.f32.xlu0 %v285_v4  ;;  %p528_p12 = pnand %p527_p11, %p674_p5  ;;  %p535_p2 = por %p534_p1, %p533_p0 }
  0x23   : > { %p529_p13 = pneg %p528_p12 }
  0x25   : > { %p536_p3 = pnand %p535_p2, %p529_p13 }
  0x90   : > { %v323_v39 = vpop.permute.xlu1 %322 }
  0x91   : > { %v330_v40 = vrot.slane %v323_v39, %v329_v38 }
  0x93   : > { %v332_v41 = vmul.f32 %v330_v40, %v689_v0 }
  0x95   : > { %v334_v42 = vcombine.high %v332_v41, %v332_v41  ;;  %v336_v43 = vsel %vm282_vm0, %v332_v41, 0.0 }
  0x96   : > { %v337_v45 = vrot.slane %v336_v43, 4 }
  0x97   : > { %v343_v44 = vsel %vm282_vm0, %v334_v42, 0.0 }
  0x98   : > { %v344_v46 = vrot.slane %v343_v44, 4  ;;  %v338_v47 = vadd.f32 %v337_v45, %v336_v43 }
  0x9a   : > { %v345_v48 = vadd.f32 %v344_v46, %v343_v44  ;;  %v339_v49 = vrot.slane %v338_v47, 2 }
  0x9c   : > { %v346_v50 = vrot.slane %v345_v48, 2  ;;  %v340_v51 = vadd.f32 %v339_v49, %v338_v47 }
  0x9e   : > { %v347_v52 = vadd.f32 %v346_v50, %v345_v48  ;;  %v341_v53 = vrot.slane %v340_v51, 1 }
  0xa0   : > { %v348_v54 = vrot.slane %v347_v52, 1  ;;  %v342_v55 = vadd.f32 %v341_v53, %v340_v51 }
  0xa2   : > { %v349_v57 = vadd.f32 %v348_v54, %v347_v52  ;;  %v352_v58 = vadd.f32 %v351_v56, %v342_v55 }
  0xa4   : > { %v353_v59 = vadd.f32 %v351_v56, %v349_v57  ;;  %v461_v60 = vmul.f32 -1.442695, %v352_v58 }
  0xa6   : > { %v462_v61 = vmul.f32 -1.442695, %v353_v59 }
  0xae   : > { %v287_v8 = vpop.xlane.xlu0 %286 }
  0xaf   : > { %v288_v9 = vmul.f32 0.00390625, %v287_v8 }
  0xb1   : > { %v290_v10 = vmul.f32 %v289_v7, %v288_v9 }
  0xb3   : > { %v292_v11 = vsel %vm291_vm1, %v290_v10, 0.0 }
  0xb4   : > { %v293_v12 = vrot.slane %v292_v11, 4 }
  0xb6   : > { %v294_v13 = vadd.f32 %v293_v12, %v292_v11 }
  0xb8   : > { %v295_v14 = vrot.slane %v294_v13, 2 }
  0xba   : > { %v296_v16 = vadd.f32 %v295_v14, %v294_v13 }
  0xbc   : > { %v297_v17 = vrot.slane %v296_v16, 1 }
  0xbe   : > { %v298_v20 = vadd.f32 %v297_v17, %v296_v16 }
  0xc0   : > { %v300_v21 = vadd.f32 %v299_v19, %v298_v20 }
  0xc2   : > { %v301_v23 = vmax.f32 %v300_v21, 0.0 }
  0xc4   : > { %v306_v25 = vrot.slane %v301_v23, %v305_v22 }
  0xc6   : > { %v307_v26 = vmul.f32 %v306_v25, %v302_v24 }
  0xc8   : > { %v308_v27 = vsel %vm291_vm1, %v307_v26, 0.0 }
  0xc9   : > { %309 = vadd.xlane.f32.xlu0 %v308_v27 }
 0x156   : > { %v310_v29 = vpop.xlane.xlu0 %309 }
 0x157   : > { %v312_v30 = vadd.f32 %v311_v28, %v310_v29 }
 0x159   : > { %v460_v31 = vmul.f32 -1.442695, %v312_v30 }
 0x15b   : > { %514 = vpow2.f32 %v460_v31 }
 0x165   : > { %v515_v32 = vpop.eup %514 }
 0x166   : > { %v316_v33 = vadd.f32 1.0, %v515_v32 }
 0x168   : > { %516 = vrcp.f32 %v316_v33 }
 0x169   : > { %518 = vpow2.f32 %v461_v60 }
 0x16a   : > { %520 = vpow2.f32 %v462_v61 }
 0x172   : > { %v517_v34 = vpop.eup %516 }
 0x173   : > { %368 = vperm.xlu1 %511, %v517_v34   ;;  %v519_v62 = vpop.eup %518 }
 0x174   : > { %v521_v63 = vpop.eup %520  ;;  %v360_v1 = vadd.f32 1.0, %v519_v62 }
 0x175   : > { %v361_v2 = vadd.f32 1.0, %v521_v63 }
 0x176   : > { %522 = vrcp.f32 %v360_v1 }
 0x177   : > { %524 = vrcp.f32 %v361_v2 }
 0x180   : > { %v523_v3 = vpop.eup %522 }
 0x181   : > { %v525_v4 = vpop.eup %524 }
 0x1f2   : > { %v369_v5 = vpop.permute.xlu1 %368 }
 0x1f3   : > { %v371_v6 = vadd.f32 %v523_v3, %v369_v5  ;;  %v372_v7 = vadd.f32 %v525_v4, %v369_v5 }
 0x1f5   : > { %v375_v8 = vcombine.low %v371_v6, %v372_v7 }
 0x1f7   : > { %v377_v9 = vmul.f32 %v375_v8, %v689_v0 }
 0x1f9   : > { %378 = vst [vmem:[%s272_s18] sm:$0xff] %v377_v9 }
 0x1fa   : > { %539 = shalt.err (!%p536_p3)
}
 0x1fb   : > { %s540_s9 = scalar_lea.hbm %s722_s22, 128  ;;  %s544_s15 = scalar_lea.hbm %s771_s7, 256 }
 0x1fc   : > { %p541_p4 = scmp.ne.s32.totalorder %s722_s22, %s540_s9  ;;  %p545_p9 = scmp.lt.u32.totalorder %s722_s22, %s771_s7 }
 0x1fd   : > { %p546_p10 = scmp.lt.u32.totalorder %s544_s15, %s540_s9  ;;  %p548_p12 = scmp.lt.u32.totalorder %s540_s9, %s722_s22 }
 0x1fe   : > { %p542_p7 = pnand %p541_p4, %p674_p5 }
 0x1ff   : > { %p547_p11 = por %p546_p10, %p545_p9 }
 0x200   : > { %p543_p8 = pneg %p542_p7 }
 0x201   : > { %p549_p13 = por %p548_p12, %p547_p11 }
 0x203   : > { %p550_p0 = pnand %p549_p13, %p543_p8 }
 0x205   : > { %553 = shalt.err (!%p550_p0)
}
 0x206   : > { %470 = dma.vmem_to_hbm [thread:$0]  (%p674_p5), %s724_s19, 128, %s722_s22, %s380_s23  }
 0x207 PF: > { %p476_p1 = scmp.ge.s32.totalorder %s588_s29, 2  ;;  %s406_s18 = sand.u32 1, %s576_s26  }
 0x208   : > { %s407_s20 = scalar_lea.sflag [#allocation4], %s406_s18 }
 0x209   : > { %p473_p2 = pnand %p476_p1, %p678_p6 }
 0x20b   : > { %571 = dma.done.wait (!%p473_p2), %s407_s20, 128  }
 0x20c   : > { %573 = vsyncadd (!%p473_p2), %s407_s20, 4294967168  ;;  %p18_p3 = scmp.ge.s32.totalorder %s661_s8, 4   ;;  %s774_s26 = smov %s580_s27 }
 0x20d   : > { %s775_s27 = smov %s584_s28  ;;  %s776_s28 = smov %s672_s11 }
 0x20e   : > { %s777_s29 = smov %s661_s8  ;;  %20 = sbr.rel (!%p18_p3) target bundleno = 5 (0x5), region = 83 }
 0x215   :  { %412 = vsyncpa [#allocation4], 1 }
 0x216   :  { %414 = vsyncpa [#allocation4 + $0x1], 1 }

</bundles_post_ra>
